<compile_context>
chip_gen: v5e
topology: v5e:2x2
jax: 0.10.0
libtpu: 0.0.40
codegen_flags: <defaults>
</compile_context>

<pallas_src>
import functools

import jax
import jax.numpy as jnp
from jax.experimental import pallas as pl
from jax.experimental.pallas import tpu as pltpu

LANE = 128      # lane width: feature-dim padding target
SUBLANE = 8     # sublane width: batch padding target


def _round_up(n, m):
    return (n + m - 1) // m * m


def _mlp_relu_kernel(x_ref, w_ref, b_ref, o_ref, *, num_layers):
    """Fused MLP: h = relu(h @ W_l + b_l) for every layer, activation stays on-chip."""
    h = x_ref[...].astype(jnp.float32)
    for l in range(num_layers):                  # static Python loop -> fully unrolled
        y = jnp.dot(h, w_ref[l], preferred_element_type=jnp.float32)
        h = jnp.maximum(y + b_ref[l], 0.0)       # bias broadcast + ReLU on f32 accumulator
    o_ref[...] = h.astype(o_ref.dtype)


def pack_params(params, dtype=jnp.float32):
    """One-time host-side packing: zero-pad each (w:(In,Out), b:(1,Out)) to a
    lane-dense (P,P)/(1,P) and stack all layers.  Returns (w_stack, b_stack, out_dim)."""
    dims = [params[0][0].shape[0]] + [w.shape[1] for w, _ in params]
    P = _round_up(max(dims), LANE)
    ws, bs = [], []
    for w, b in params:
        fi, fo = w.shape
        wp = jnp.zeros((P, P), dtype).at[:fi, :fo].set(w.astype(dtype))
        bp = jnp.zeros((1, P), dtype).at[:, :fo].set(b.reshape(1, fo).astype(dtype))
        ws.append(wp)
        bs.append(bp)
    return jnp.stack(ws), jnp.stack(bs), dims[-1]


def nn_relu_fused(x, w_stack, b_stack, out_dim, *, bm=None):
    """x:(B, In) -> ReLU-MLP output (B, out_dim), all layers fused in one pallas_call."""
    B, In = x.shape
    L, P, _ = w_stack.shape
    Bp = _round_up(B, SUBLANE)
    # Lane-dense, sublane-aligned padded input (zeros in padded lanes/rows are harmless).
    xp = jnp.zeros((Bp, P), x.dtype).at[:B, :In].set(x)

    if bm is None:
        bm = min(Bp, 512)                 # large batches: ~512-row tiles pipeline well
    bm = min(_round_up(bm, SUBLANE), Bp)
    grid = (pl.cdiv(Bp, bm),)

    # TODO(synk): if hidden_dim ever scales to multi-thousand, add K/N grid axes with a
    # VMEM f32 accumulator + pl.when init/finalize (and set vmem_limit_bytes) instead of
    # holding full (P, P) weights per layer — needed to stay within v7x's 64 MiB VMEM.
    kernel = functools.partial(_mlp_relu_kernel, num_layers=L)
    out = pl.pallas_call(
        kernel,
        out_shape=jax.ShapeDtypeStruct((Bp, P), x.dtype),
        grid_spec=pltpu.PrefetchScalarGridSpec(
            num_scalar_prefetch=0,
            grid=grid,
            in_specs=[
                pl.BlockSpec((bm, P), lambda i: (i, 0)),        # activation batch tile
                pl.BlockSpec((L, P, P), lambda i: (0, 0, 0)),   # all weights, VMEM-resident
                pl.BlockSpec((L, 1, P), lambda i: (0, 0, 0)),   # all biases
            ],
            out_specs=pl.BlockSpec((bm, P), lambda i: (i, 0)),  # lane-dense (128-wide) output
        ),
        compiler_params=pltpu.CompilerParams(
            dimension_semantics=("parallel",),  # batch tiles independent (megacore on v7x)
        ),
    )(xp, w_stack, b_stack)
    return out[:B, :out_dim]


@functools.partial(jax.jit, static_argnames=("out_dim", "bm"))
def nn_relu_forward(x, w_stack, b_stack, *, out_dim, bm=None):
    return nn_relu_fused(x, w_stack, b_stack, out_dim, bm=bm)


def init_nn_relu_params(key, input_dim, hidden_dim, hidden_num, z0_dim,
                        dtype=jnp.float32):
    """Mimics nn.Linear.reset_parameters(): U(-1/sqrt(fan_in), 1/sqrt(fan_in)) for W and b.
    Weights are stored as (in_features, out_features) == PyTorch W^T."""
    dims = [input_dim] + [hidden_dim] * hidden_num + [z0_dim]
    params = []
    for fan_in, fan_out in zip(dims[:-1], dims[1:]):
        key, kw, kb = jax.random.split(key, 3)
        bound = 1.0 / float(fan_in) ** 0.5
        w = jax.random.uniform(kw, (fan_in, fan_out), dtype, -bound, bound)
        b = jax.random.uniform(kb, (1, fan_out), dtype, -bound, bound)
        params.append((w, b))
    return params


if __name__ == "__main__":
    # Small shapes consistent with the module.
    batch = 8
    input_dim = 16
    hidden_dim = 32
    hidden_num = 3   # layers: in->h, h->h, h->h, h->z0  (hidden_num + 1 Linear layers)
    z0_dim = 8

    key = jax.random.PRNGKey(0)
    key, kx = jax.random.split(key)
    x = jax.random.normal(kx, (batch, input_dim), dtype=jnp.float32)

    params = init_nn_relu_params(key, input_dim, hidden_dim, hidden_num, z0_dim)
    w_stack, b_stack, out_dim = pack_params(params)     # one-time host-side pad + stack

    z0 = nn_relu_forward(x, w_stack, b_stack, out_dim=out_dim)
    jax.block_until_ready(z0)

    # Sanity: plain-JAX reference must match the fused Pallas path.
    ref = x
    for w, b in params:
        ref = jnp.maximum(ref @ w + b, 0.0)
    assert z0.shape == (batch, z0_dim), z0.shape
    assert jnp.allclose(z0, ref, atol=1e-5, rtol=1e-5)

    print("KERNEL_OK")
</pallas_src>

<mosaic_0001>
module attributes {stable_mosaic.version = 11 : i64} {
  func.func @_mlp_relu_kernel(%arg0: i32, %arg1: memref<8x128xf32, #tpu.memory_space<vmem>>, %arg2: memref<4x128x128xf32, #tpu.memory_space<vmem>>, %arg3: memref<4x1x128xf32, #tpu.memory_space<vmem>>, %arg4: memref<8x128xf32, #tpu.memory_space<vmem>>) attributes {dimension_semantics = [#tpu.dimension_semantics<parallel>], iteration_bounds = array<i64: 1>, scalar_prefetch = 0 : i64, scratch_operands = 0 : i64, tpu.core_type = #tpu.core_type<tc>, window_params = [{transform_indices = @transform_0, window_bounds = array<i64: 8, 128>}, {pipeline_mode = #tpu.pipeline_mode<synchronous>, transform_indices = @transform_1, window_bounds = array<i64: 4, 128, 128>}, {pipeline_mode = #tpu.pipeline_mode<synchronous>, transform_indices = @transform_2, window_bounds = array<i64: 4, 1, 128>}, {transform_indices = @transform_3, window_bounds = array<i64: 8, 128>}]} {
    %c0 = arith.constant 0 : index
    %c0_0 = arith.constant 0 : index
    %0 = vector.load %arg1[%c0, %c0_0] : memref<8x128xf32, #tpu.memory_space<vmem>>, vector<8x128xf32>
    %c0_1 = arith.constant 0 : index
    %c0_2 = arith.constant 0 : index
    %c0_3 = arith.constant 0 : index
    %1 = vector.load %arg2[%c0_1, %c0_2, %c0_3] : memref<4x128x128xf32, #tpu.memory_space<vmem>>, vector<1x128x128xf32>
    %2 = vector.shape_cast %1 : vector<1x128x128xf32> to vector<128x128xf32>
    %cst = arith.constant dense<0.000000e+00> : vector<8x128xf32>
    %3 = tpu.matmul %0, %2, %cst {dimension_numbers = #tpu.dot_dimension_numbers<[1], [0], [0], [1], [0, 0, 1, 1], [], []>} : vector<8x128xf32>, vector<128x128xf32>, vector<8x128xf32> -> vector<8x128xf32>
    %c0_4 = arith.constant 0 : index
    %c0_5 = arith.constant 0 : index
    %c0_6 = arith.constant 0 : index
    %4 = vector.load %arg3[%c0_4, %c0_5, %c0_6] : memref<4x1x128xf32, #tpu.memory_space<vmem>>, vector<1x1x128xf32>
    %5 = vector.shape_cast %4 : vector<1x1x128xf32> to vector<1x128xf32>
    %6 = vector.broadcast %5 : vector<1x128xf32> to vector<8x128xf32>
    %7 = arith.addf %3, %6 : vector<8x128xf32>
    %cst_7 = arith.constant 0.000000e+00 : f32
    %8 = vector.broadcast %cst_7 : f32 to vector<8x128xf32>
    %9 = arith.maximumf %7, %8 : vector<8x128xf32>
    %c1 = arith.constant 1 : index
    %c0_8 = arith.constant 0 : index
    %c0_9 = arith.constant 0 : index
    %10 = vector.load %arg2[%c1, %c0_8, %c0_9] : memref<4x128x128xf32, #tpu.memory_space<vmem>>, vector<1x128x128xf32>
    %11 = vector.shape_cast %10 : vector<1x128x128xf32> to vector<128x128xf32>
    %cst_10 = arith.constant dense<0.000000e+00> : vector<8x128xf32>
    %12 = tpu.matmul %9, %11, %cst_10 {dimension_numbers = #tpu.dot_dimension_numbers<[1], [0], [0], [1], [0, 0, 1, 1], [], []>} : vector<8x128xf32>, vector<128x128xf32>, vector<8x128xf32> -> vector<8x128xf32>
    %c1_11 = arith.constant 1 : index
    %c0_12 = arith.constant 0 : index
    %c0_13 = arith.constant 0 : index
    %13 = vector.load %arg3[%c1_11, %c0_12, %c0_13] : memref<4x1x128xf32, #tpu.memory_space<vmem>>, vector<1x1x128xf32>
    %14 = vector.shape_cast %13 : vector<1x1x128xf32> to vector<1x128xf32>
    %15 = vector.broadcast %14 : vector<1x128xf32> to vector<8x128xf32>
    %16 = arith.addf %12, %15 : vector<8x128xf32>
    %cst_14 = arith.constant 0.000000e+00 : f32
    %17 = vector.broadcast %cst_14 : f32 to vector<8x128xf32>
    %18 = arith.maximumf %16, %17 : vector<8x128xf32>
    %c2 = arith.constant 2 : index
    %c0_15 = arith.constant 0 : index
    %c0_16 = arith.constant 0 : index
    %19 = vector.load %arg2[%c2, %c0_15, %c0_16] : memref<4x128x128xf32, #tpu.memory_space<vmem>>, vector<1x128x128xf32>
    %20 = vector.shape_cast %19 : vector<1x128x128xf32> to vector<128x128xf32>
    %cst_17 = arith.constant dense<0.000000e+00> : vector<8x128xf32>
    %21 = tpu.matmul %18, %20, %cst_17 {dimension_numbers = #tpu.dot_dimension_numbers<[1], [0], [0], [1], [0, 0, 1, 1], [], []>} : vector<8x128xf32>, vector<128x128xf32>, vector<8x128xf32> -> vector<8x128xf32>
    %c2_18 = arith.constant 2 : index
    %c0_19 = arith.constant 0 : index
    %c0_20 = arith.constant 0 : index
    %22 = vector.load %arg3[%c2_18, %c0_19, %c0_20] : memref<4x1x128xf32, #tpu.memory_space<vmem>>, vector<1x1x128xf32>
    %23 = vector.shape_cast %22 : vector<1x1x128xf32> to vector<1x128xf32>
    %24 = vector.broadcast %23 : vector<1x128xf32> to vector<8x128xf32>
    %25 = arith.addf %21, %24 : vector<8x128xf32>
    %cst_21 = arith.constant 0.000000e+00 : f32
    %26 = vector.broadcast %cst_21 : f32 to vector<8x128xf32>
    %27 = arith.maximumf %25, %26 : vector<8x128xf32>
    %c3 = arith.constant 3 : index
    %c0_22 = arith.constant 0 : index
    %c0_23 = arith.constant 0 : index
    %28 = vector.load %arg2[%c3, %c0_22, %c0_23] : memref<4x128x128xf32, #tpu.memory_space<vmem>>, vector<1x128x128xf32>
    %29 = vector.shape_cast %28 : vector<1x128x128xf32> to vector<128x128xf32>
    %cst_24 = arith.constant dense<0.000000e+00> : vector<8x128xf32>
    %30 = tpu.matmul %27, %29, %cst_24 {dimension_numbers = #tpu.dot_dimension_numbers<[1], [0], [0], [1], [0, 0, 1, 1], [], []>} : vector<8x128xf32>, vector<128x128xf32>, vector<8x128xf32> -> vector<8x128xf32>
    %c3_25 = arith.constant 3 : index
    %c0_26 = arith.constant 0 : index
    %c0_27 = arith.constant 0 : index
    %31 = vector.load %arg3[%c3_25, %c0_26, %c0_27] : memref<4x1x128xf32, #tpu.memory_space<vmem>>, vector<1x1x128xf32>
    %32 = vector.shape_cast %31 : vector<1x1x128xf32> to vector<1x128xf32>
    %33 = vector.broadcast %32 : vector<1x128xf32> to vector<8x128xf32>
    %34 = arith.addf %30, %33 : vector<8x128xf32>
    %cst_28 = arith.constant 0.000000e+00 : f32
    %35 = vector.broadcast %cst_28 : f32 to vector<8x128xf32>
    %36 = arith.maximumf %34, %35 : vector<8x128xf32>
    %c0_29 = arith.constant 0 : index
    %c0_30 = arith.constant 0 : index
    %37 = vector.load %arg4[%c0_29, %c0_30] : memref<8x128xf32, #tpu.memory_space<vmem>>, vector<8x128xf32>
    tpu.vector_store %arg4[%c0_29, %c0_30], %36 {strides = array<i32>} : memref<8x128xf32, #tpu.memory_space<vmem>>, vector<8x128xf32>,
    return
  }
  func.func @transform_0(%arg0: i32) -> (i32, i32) {
    %c0_i32 = arith.constant 0 : i32
    %c0_i32_0 = arith.constant 0 : i32
    return %arg0, %c0_i32 : i32, i32
  }
  func.func @transform_1(%arg0: i32) -> (i32, i32, i32) {
    %c0_i32 = arith.constant 0 : i32
    %c0_i32_0 = arith.constant 0 : i32
    %c0_i32_1 = arith.constant 0 : i32
    %c0_i32_2 = arith.constant 0 : i32
    return %c0_i32, %c0_i32_0, %c0_i32_1 : i32, i32, i32
  }
  func.func @transform_2(%arg0: i32) -> (i32, i32, i32) {
    %c0_i32 = arith.constant 0 : i32
    %c0_i32_0 = arith.constant 0 : i32
    %c0_i32_1 = arith.constant 0 : i32
    %c0_i32_2 = arith.constant 0 : i32
    return %c0_i32, %c0_i32_0, %c0_i32_1 : i32, i32, i32
  }
  func.func @transform_3(%arg0: i32) -> (i32, i32) {
    %c0_i32 = arith.constant 0 : i32
    %c0_i32_0 = arith.constant 0 : i32
    return %arg0, %c0_i32 : i32, i32
  }
}

</mosaic_0001>

<bundles_post_ra>
// kernel: nn_relu_forward.1
= control target key start
LH: loop header
LB: loop body
LE: loop exit
PB: predicated region body
PF: predicated region fallthrough
CT: control target
= control target key end

     0   :  { %8 = vsyncpa [#allocation3], 0  ;;  %s328_s0 = inlined_call_operand.vmem [shape: f32[8,128], index: 0, kind: input, shape index: {}]   ;;  %s329_s1 = inlined_call_operand.hbm [shape: f32[4,128,128], index: 1, kind: input, shape index: {}]   ;;  %s330_s2 = inlined_call_operand.vmem [shape: f32[4,1,128], index: 2, kind: input, shape index: {}]   ;;  %s331_s3 = inlined_call_operand.hbm [shape: f32[8,128], index: 3, kind: output, shape index: {}]  }
   0x1   :  { %9 = vsyncpa [#allocation4], 0  ;;  %s16_s14 = sshll.u32 %s329_s1, 4  ;;  %s283_s15 = smov [#allocation2]   ;;  %s17_s14 = int_to_ptr.hbm [resolvable:$true] %s16_s14 }
   0x2   :  { %s18_s16 = sshll.u32 %s283_s15, 4  ;;  %s284_s17 = smov 128   ;;  %s19_s16 = int_to_ptr.vmem [resolvable:$true] %s18_s16 }
   0x3   :  { %s285_s18 = smov 8  }
   0x4   :  { %24 = dma.hbm_to_vmem [thread:$0]  %s17_s14, 8192, %s19_s16, [#allocation3], %s284_s17, %s284_s17, %s285_s18  }
   0x5   :  { %279 = dma.done.wait [#allocation3], 8192  }
   0x6   :  { %280 = vsyncadd [#allocation3], 4294959104  ;;  %v47_v0 = vld [vmem:[#allocation2 + $0x78] sm:$0xff]  ;;  %v46_v1 = vld [vmem:[#allocation2 + $0x70] sm:$0xff]  ;;  %s286_s27 = smov [#allocation5]   ;;  %s210_s4 = sshll.u32 %s331_s3, 4  ;;  %s211_s4 = int_to_ptr.hbm [resolvable:$true] %s210_s4 }
   0x7   :  { %52 = vmatpush.msra.mxu0 %v47_v0  ;;  %v45_v2 = vld [vmem:[#allocation2 + $0x68] sm:$0xff]  ;;  %v44_v3 = vld [vmem:[#allocation2 + $0x60] sm:$0xff]  ;;  %v89_v4 = vld [vmem:[#allocation2 + $0xf8] sm:$0xff]  ;;  %s208_s28 = sshll.u32 %s286_s27, 4  ;;  %s209_s28 = int_to_ptr.vmem [resolvable:$true] %s208_s28 }
   0x8   :  { %v43_v5 = vld [vmem:[#allocation2 + $0x58] sm:$0xff]  ;;  %95 = vmatpush.msra.mxu1 %v89_v4  ;;  %v88_v6 = vld [vmem:[#allocation2 + $0xf0] sm:$0xff]  ;;  %v87_v7 = vld [vmem:[#allocation2 + $0xe8] sm:$0xff] }
   0x9   :  { %53 = vmatpush.msra.mxu0 %v46_v1  ;;  %v42_v8 = vld [vmem:[#allocation2 + $0x50] sm:$0xff]  ;;  %v86_v9 = vld [vmem:[#allocation2 + $0xe0] sm:$0xff]  ;;  %v41_v10 = vld [vmem:[#allocation2 + $0x48] sm:$0xff] }
   0xa   :  { %96 = vmatpush.msra.mxu1 %v88_v6  ;;  %v85_v11 = vld [vmem:[#allocation2 + $0xd8] sm:$0xff]  ;;  %v40_v12 = vld [vmem:[#allocation2 + $0x40] sm:$0xff]  ;;  %v84_v13 = vld [vmem:[#allocation2 + $0xd0] sm:$0xff] }
   0xb   :  { %54 = vmatpush.msra.mxu0 %v45_v2  ;;  %v39_v14 = vld [vmem:[#allocation2 + $0x38] sm:$0xff]  ;;  %v83_v15 = vld [vmem:[#allocation2 + $0xc8] sm:$0xff]  ;;  %v38_v16 = vld [vmem:[#allocation2 + $0x30] sm:$0xff] }
   0xc   :  { %97 = vmatpush.msra.mxu1 %v87_v7  ;;  %v82_v17 = vld [vmem:[#allocation2 + $0xc0] sm:$0xff]  ;;  %v37_v18 = vld [vmem:[#allocation2 + $0x28] sm:$0xff]  ;;  %v81_v19 = vld [vmem:[#allocation2 + $0xb8] sm:$0xff] }
   0xd   :  { %55 = vmatpush.msra.mxu0 %v44_v3  ;;  %v36_v20 = vld [vmem:[#allocation2 + $0x20] sm:$0xff]  ;;  %v80_v21 = vld [vmem:[#allocation2 + $0xb0] sm:$0xff]  ;;  %v35_v22 = vld [vmem:[#allocation2 + $0x18] sm:$0xff] }
   0xe   :  { %98 = vmatpush.msra.mxu1 %v86_v9  ;;  %v79_v23 = vld [vmem:[#allocation2 + $0xa8] sm:$0xff]  ;;  %v34_v24 = vld [vmem:[#allocation2 + $0x10] sm:$0xff]  ;;  %v78_v25 = vld [vmem:[#allocation2 + $0xa0] sm:$0xff] }
   0xf   :  { %56 = vmatpush.msra.mxu0 %v43_v5  ;;  %v33_v26 = vld [vmem:[#allocation2 + $0x8] sm:$0xff]  ;;  %v77_v27 = vld [vmem:[#allocation2 + $0x98] sm:$0xff]  ;;  %v32_v28 = vld [vmem:[#allocation2] sm:$0xff] }
  0x10   :  { %99 = vmatpush.msra.mxu1 %v85_v11  ;;  %v31_v29 = vld [vmem:[%s328_s0] sm:$0xff]  ;;  %v76_v30 = vld [vmem:[#allocation2 + $0x90] sm:$0xff]  ;;  %v75_v31 = vld [vmem:[#allocation2 + $0x88] sm:$0xff] }
  0x11   :  { %57 = vmatpush.msra.mxu0 %v42_v8  ;;  %v74_v32 = vld [vmem:[#allocation2 + $0x80] sm:$0xff]  ;;  %v132_v33 = vld [vmem:[#allocation2 + $0x178] sm:$0xff]  ;;  %v131_v34 = vld [vmem:[#allocation2 + $0x170] sm:$0xff] }
  0x12   :  { %100 = vmatpush.msra.mxu1 %v84_v13  ;;  %138 = vmatpush.msra.mxu2 %v132_v33  ;;  %v130_v35 = vld [vmem:[#allocation2 + $0x168] sm:$0xff]  ;;  %v129_v36 = vld [vmem:[#allocation2 + $0x160] sm:$0xff]  ;;  %v128_v37 = vld [vmem:[#allocation2 + $0x158] sm:$0xff] }
  0x13   :  { %58 = vmatpush.msra.mxu0 %v41_v10  ;;  %v127_v38 = vld [vmem:[#allocation2 + $0x150] sm:$0xff]  ;;  %v126_v39 = vld [vmem:[#allocation2 + $0x148] sm:$0xff]  ;;  %v125_v40 = vld [vmem:[#allocation2 + $0x140] sm:$0xff] }
  0x14   :  { %101 = vmatpush.msra.mxu1 %v83_v15  ;;  %139 = vmatpush.msra.mxu2 %v131_v34  ;;  %v124_v41 = vld [vmem:[#allocation2 + $0x138] sm:$0xff]  ;;  %v123_v42 = vld [vmem:[#allocation2 + $0x130] sm:$0xff]  ;;  %v122_v43 = vld [vmem:[#allocation2 + $0x128] sm:$0xff] }
  0x15   :  { %59 = vmatpush.msra.mxu0 %v40_v12  ;;  %v121_v44 = vld [vmem:[#allocation2 + $0x120] sm:$0xff]  ;;  %v120_v45 = vld [vmem:[#allocation2 + $0x118] sm:$0xff]  ;;  %v119_v50 = vld [vmem:[#allocation2 + $0x110] sm:$0xff] }
  0x16   :  { %102 = vmatpush.msra.mxu1 %v82_v17  ;;  %140 = vmatpush.msra.mxu2 %v130_v35  ;;  %v227_v46 = vld [vmem:[%s330_s2] ss:$0 sm:$0xff]  ;;  %v118_v51 = vld [vmem:[#allocation2 + $0x108] sm:$0xff]  ;;  %v175_v53 = vld [vmem:[#allocation2 + $0x1f8] sm:$0xff] }
  0x17   :  { %60 = vmatpush.msra.mxu0 %v39_v14  ;;  %v117_v52 = vld [vmem:[#allocation2 + $0x100] sm:$0xff]  ;;  %v174_v54 = vld [vmem:[#allocation2 + $0x1f0] sm:$0xff]  ;;  %181 = vmatpush.msra.mxu3 %v175_v53  ;;  %v173_v55 = vld [vmem:[#allocation2 + $0x1e8] sm:$0xff] }
  0x18   :  { %103 = vmatpush.msra.mxu1 %v81_v19  ;;  %141 = vmatpush.msra.mxu2 %v129_v36  ;;  %v172_v56 = vld [vmem:[#allocation2 + $0x1e0] sm:$0xff]  ;;  %v171_v57 = vld [vmem:[#allocation2 + $0x1d8] sm:$0xff]  ;;  %v170_v58 = vld [vmem:[#allocation2 + $0x1d0] sm:$0xff] }
  0x19   :  { %61 = vmatpush.msra.mxu0 %v38_v16  ;;  %182 = vmatpush.msra.mxu3 %v174_v54  ;;  %v169_v59 = vld [vmem:[#allocation2 + $0x1c8] sm:$0xff]  ;;  %v168_v60 = vld [vmem:[#allocation2 + $0x1c0] sm:$0xff]  ;;  %v167_v61 = vld [vmem:[#allocation2 + $0x1b8] sm:$0xff] }
  0x1a   :  { %104 = vmatpush.msra.mxu1 %v80_v21  ;;  %142 = vmatpush.msra.mxu2 %v128_v37  ;;  %v166_v62 = vld [vmem:[#allocation2 + $0x1b0] sm:$0xff]  ;;  %v165_v63 = vld [vmem:[#allocation2 + $0x1a8] sm:$0xff]  ;;  %v164_v0 = vld [vmem:[#allocation2 + $0x1a0] sm:$0xff] }
  0x1b   :  { %62 = vmatpush.msra.mxu0 %v37_v18  ;;  %183 = vmatpush.msra.mxu3 %v173_v55  ;;  %v163_v1 = vld [vmem:[#allocation2 + $0x198] sm:$0xff]  ;;  %v228_v2 = vld [vmem:[%s330_s2 + $0x1] ss:$0 sm:$0xff]  ;;  %v162_v6 = vld [vmem:[#allocation2 + $0x190] sm:$0xff] }
  0x1c   :  { %105 = vmatpush.msra.mxu1 %v79_v23  ;;  %143 = vmatpush.msra.mxu2 %v127_v38  ;;  %v161_v7 = vld [vmem:[#allocation2 + $0x188] sm:$0xff]  ;;  %v160_v8 = vld [vmem:[#allocation2 + $0x180] sm:$0xff] }
  0x1d   :  { %63 = vmatpush.msra.mxu0 %v36_v20  ;;  %184 = vmatpush.msra.mxu3 %v172_v56  ;;  %v229_v9 = vld [vmem:[%s330_s2 + $0x2] ss:$0 sm:$0xff]  ;;  %v230_v13 = vld [vmem:[%s330_s2 + $0x3] ss:$0 sm:$0xff] }
  0x1e   :  { %106 = vmatpush.msra.mxu1 %v78_v25  ;;  %144 = vmatpush.msra.mxu2 %v126_v39 }
  0x1f   :  { %64 = vmatpush.msra.mxu0 %v35_v22  ;;  %185 = vmatpush.msra.mxu3 %v171_v57 }
  0x20   :  { %107 = vmatpush.msra.mxu1 %v77_v27  ;;  %145 = vmatpush.msra.mxu2 %v125_v40 }
  0x21   :  { %65 = vmatpush.msra.mxu0 %v34_v24  ;;  %186 = vmatpush.msra.mxu3 %v170_v58 }
  0x22   :  { %108 = vmatpush.msra.mxu1 %v76_v30  ;;  %146 = vmatpush.msra.mxu2 %v124_v41 }
  0x23   :  { %66 = vmatpush.msra.mxu0 %v33_v26  ;;  %187 = vmatpush.msra.mxu3 %v169_v59 }
  0x24   :  { %109 = vmatpush.msra.mxu1 %v75_v31  ;;  %147 = vmatpush.msra.mxu2 %v123_v42 }
  0x25   :  { %67 = vmatpush.msra.mxu0 %v32_v28  ;;  %188 = vmatpush.msra.mxu3 %v168_v60 }
  0x26   :  { %68 = vmatmul.f32.vlgmr.msra.gmra.mxu0 %v31_v29  ;;  %110 = vmatpush.msra.mxu1 %v74_v32 }
  0x27   :  { %148 = vmatpush.msra.mxu2 %v122_v43  ;;  %189 = vmatpush.msra.mxu3 %v167_v61 }
  0x29   :  { %149 = vmatpush.msra.mxu2 %v121_v44  ;;  %190 = vmatpush.msra.mxu3 %v166_v62 }
  0x2b   :  { %150 = vmatpush.msra.mxu2 %v120_v45  ;;  %191 = vmatpush.msra.mxu3 %v165_v63 }
  0x2d   :  { %151 = vmatpush.msra.mxu2 %v119_v50  ;;  %192 = vmatpush.msra.mxu3 %v164_v0 }
  0x2f   :  { %152 = vmatpush.msra.mxu2 %v118_v51  ;;  %193 = vmatpush.msra.mxu3 %v163_v1 }
  0x31   :  { %153 = vmatpush.msra.mxu2 %v117_v52  ;;  %194 = vmatpush.msra.mxu3 %v162_v6 }
  0x33   :  { %195 = vmatpush.msra.mxu3 %v161_v7 }
  0x35   :  { %196 = vmatpush.msra.mxu3 %v160_v8 }
  0xa3   :  { %v69_v47 = vpop.f32.mrf.mxu0 }
  0xa4   :  { %v70_v48 = vadd.f32 %v227_v46, %v69_v47 }
  0xa6   :  { %v72_v49 = vmax.f32 %v70_v48, 0.0 }
  0xa8   :  { %111 = vmatmul.f32.vlgmr.msra.gmra.mxu1 %v72_v49 }
 0x125   :  { %v112_v3 = vpop.f32.mrf.mxu1 }
 0x126   :  { %v113_v4 = vadd.f32 %v228_v2, %v112_v3 }
 0x128   :  { %v115_v5 = vmax.f32 %v113_v4, 0.0 }
 0x12a   :  { %154 = vmatmul.f32.vlgmr.msra.gmra.mxu2 %v115_v5 }
 0x1ad   :  { %v155_v10 = vpop.f32.mrf.mxu2 }
 0x1ae   :  { %v156_v11 = vadd.f32 %v229_v9, %v155_v10 }
 0x1b0   :  { %v158_v12 = vmax.f32 %v156_v11, 0.0 }
 0x1b2   :  { %197 = vmatmul.f32.vlgmr.msra.gmra.mxu3 %v158_v12 }
 0x235   :  { %v198_v14 = vpop.f32.mrf.mxu3 }
 0x236   :  { %v199_v15 = vadd.f32 %v230_v13, %v198_v14 }
 0x238   :  { %v201_v16 = vmax.f32 %v199_v15, 0.0 }
 0x23a   :  { %202 = vst [vmem:[#allocation5] sm:$0xff] %v201_v16 }
 0x23b   :  { %213 = dma.vmem_to_hbm [thread:$0]  %s209_s28, 128, %s211_s4, [#allocation4]  }
 0x23c   :  { %281 = dma.done.wait [#allocation4], 128  }
 0x23d   :  { %282 = vsyncadd [#allocation4], 4294967168 }
 0x23e   :  { %218 = vsyncpa [#allocation3], 1 }
 0x23f   :  { %219 = vsyncpa [#allocation4], 1 }

</bundles_post_ra>
